<compile_context>
chip_gen: v5e
topology: v5e:2x2
jax: 0.10.0
libtpu: 0.0.40
codegen_flags: <defaults>
</compile_context>

<pallas_src>
import math
from functools import partial

import jax
import jax.numpy as jnp
from jax.experimental import pallas as pl
from jax.experimental.pallas import tpu as pltpu

# ---- hyper-parameters (structurally identical to Para, scaled-down sizes) ----
KERNEL_SIZE = 16       # Para.kernel_size
STRIDE = 8             # Para.stride
NUM_HEADS = 4          # Para.attention_heads
DIM_FF = 32            # nn.TransformerEncoderLayer dim_feedforward (scaled from 2048)
LN_EPS = 1e-5          # nn.LayerNorm default eps
LANES = 128


def _transam_kernel(T, D, H, FF, S_in, BB, wcol, crow,
                    x_ref, wmat_ref, w2_ref, c_ref, out_ref):
    f32 = jnp.float32
    dh = D // H
    BD, BH, BFF = BB * D, BB * H, BB * FF
    co_q, co_k, co_v, co_o, co_g, co_ln, co_1, co_dec = wcol
    (r_conv, r_pe, r_bq, r_bk, r_bv, r_bo, r_g1, r_be1,
     r_b1, r_b2, r_g2, r_be2, r_bdec) = crow

    xb = x_ref[0]                                   # (S_in, BB*D): batch packed on lanes

    # ---- packed constants (contiguous rows, static slices) ----
    wconv = c_ref[r_conv:r_conv + T, 0:S_in]        # (T, S_in) im2col conv weights
    pe    = c_ref[r_pe:r_pe + T, 0:BD]              # (T, BD) pos-enc (+conv bias), batch-tiled
    b_q   = c_ref[r_bq:r_bq + 1, 0:BD]
    b_k   = c_ref[r_bk:r_bk + 1, 0:BD]
    b_v   = c_ref[r_bv:r_bv + 1, 0:BD]
    b_o   = c_ref[r_bo:r_bo + 1, 0:BD]
    g1    = c_ref[r_g1:r_g1 + 1, 0:BD]
    be1   = c_ref[r_be1:r_be1 + 1, 0:BD]
    b1    = c_ref[r_b1:r_b1 + 1, 0:BFF]
    b2    = c_ref[r_b2:r_b2 + 1, 0:BD]
    g2    = c_ref[r_g2:r_g2 + 1, 0:BD]
    be2   = c_ref[r_be2:r_be2 + 1, 0:BD]
    b_dec = c_ref[r_bdec:r_bdec + 1, 0:BB]

    # ---- packed weights (every chunk starts at a 128-aligned lane offset) ----
    wq   = wmat_ref[:, co_q:co_q + BD]              # (BD, BD) block-diag W_q^T
    wk   = wmat_ref[:, co_k:co_k + BD]              # (BD, BD) block-diag W_k^T
    wv   = wmat_ref[:, co_v:co_v + BD]              # (BD, BD) block-diag W_v^T
    wo   = wmat_ref[:, co_o:co_o + BD]              # (BD, BD) block-diag W_o^T
    grp  = wmat_ref[:, co_g:co_g + BH]              # (BD, BB*H) (batch,head) grouping 0/1
    gln  = wmat_ref[:, co_ln:co_ln + BD]            # (BD, BD) per-batch ones blocks (LN sums)
    w1   = wmat_ref[:, co_1:co_1 + BFF]             # (BD, BB*FF) block-diag W_1^T
    wdec = wmat_ref[:, co_dec:co_dec + BB]          # (BD, BB) block-diag decoder weight
    w2   = w2_ref[...]                              # (BB*FF, BD) block-diag W_2^T

    # ---- Conv2d(1,1,(1,K),stride) as one matmul for all BB batches, + pos-enc ----
    x = jnp.dot(wconv, xb, preferred_element_type=f32) + pe        # (T, BD) tokens
    x_last = x[T - 1:T, :]                                         # (1, BD)

    # ---- K/V for every token, Q only for the last one (module output = decoder(last)) ----
    k = jnp.dot(x, wk, preferred_element_type=f32) + b_k           # (T, BD)
    v = jnp.dot(x, wv, preferred_element_type=f32) + b_v           # (T, BD)
    q = (jnp.dot(x_last, wq, preferred_element_type=f32) + b_q) * (1.0 / math.sqrt(dh))

    # ---- all (batch, head) scores with one grouping matmul on the idle MXU ----
    s = jnp.dot(k * q, grp, preferred_element_type=f32)            # (T, BB*H)
    s = s - jnp.max(s, axis=0, keepdims=True)
    p = jnp.exp(s)
    p = p / jnp.sum(p, axis=0, keepdims=True)                      # exact softmax
    # expand per-(batch,head) probs back to lanes: p @ grp^T, then weight the values
    p_l = jax.lax.dot_general(p, grp, (((1,), (1,)), ((), ())),
                              preferred_element_type=f32)          # (T, BD)
    attn = jnp.sum(p_l * v, axis=0, keepdims=True)                 # (1, BD) head "concat"
    attn = jnp.dot(attn, wo, preferred_element_type=f32) + b_o     # (1, BD)

    # ---- per-batch LayerNorm via block-ones matmul (group mean over each batch's D lanes) ----
    def layer_norm(u, g, b):
        mu = jnp.dot(u, gln, preferred_element_type=f32) * (1.0 / D)
        uc = u - mu
        var = jnp.dot(uc * uc, gln, preferred_element_type=f32) * (1.0 / D)
        return uc * jax.lax.rsqrt(var + LN_EPS) * g + b

    y = layer_norm(x_last + attn, g1, be1)                         # (1, BD)
    hid = jnp.maximum(jnp.dot(y, w1, preferred_element_type=f32) + b1, 0.0)    # (1, BB*FF)
    ff = jnp.dot(hid, w2, preferred_element_type=f32) + b2                      # (1, BD)
    y2 = layer_norm(y + ff, g2, be2)

    # ---- decoder Linear(D, 1): lane-dense (1, BB) output, batch on the lane axis ----
    out = jnp.dot(y2, wdec, preferred_element_type=f32) + b_dec    # (1, BB)
    out_ref[...] = out.reshape(1, 1, BB)


def positional_encoding(T, D):
    position = jnp.arange(T, dtype=jnp.float32)[:, None]
    div_term = jnp.exp(jnp.arange(0, D, 2, dtype=jnp.float32)
                       * (-math.log(10000.0) / D))
    ang = position * div_term                      # (T, D//2)
    pe = jnp.zeros((T, D), jnp.float32)
    pe = pe.at[:, 0::2].set(jnp.sin(ang))
    pe = pe.at[:, 1::2].set(jnp.cos(ang))
    return pe


def init_params(key, D, K, FF):
    ks = jax.random.split(key, 8)
    p = {}
    p['conv_w'] = 0.2 * jax.random.normal(ks[0], (K,), jnp.float32)        # Conv2d weight (1,1,1,K)
    p['conv_b'] = jnp.array([[0.01]], jnp.float32)                          # Conv2d bias
    p['w_qkv'] = 0.1 * jax.random.normal(ks[1], (3 * D, D), jnp.float32)    # in_proj_weight
    p['b_qkv'] = 0.05 * jax.random.normal(ks[2], (3 * D,), jnp.float32)     # in_proj_bias
    p['w_o'] = 0.1 * jax.random.normal(ks[3], (D, D), jnp.float32)          # out_proj.weight
    p['b_o'] = jnp.zeros((D,), jnp.float32)
    p['g1'] = jnp.ones((D,), jnp.float32)                                   # norm1
    p['be1'] = jnp.zeros((D,), jnp.float32)
    p['w1'] = 0.1 * jax.random.normal(ks[4], (FF, D), jnp.float32)          # linear1
    p['b1'] = jnp.zeros((FF,), jnp.float32)
    p['w2'] = 0.1 * jax.random.normal(ks[5], (D, FF), jnp.float32)          # linear2
    p['b2'] = jnp.zeros((D,), jnp.float32)
    p['g2'] = jnp.ones((D,), jnp.float32)                                   # norm2
    p['be2'] = jnp.zeros((D,), jnp.float32)
    p['w_dec'] = jax.random.uniform(ks[6], (1, D), jnp.float32, -0.1, 0.1)  # decoder (init_weights)
    p['b_dec'] = jnp.zeros((1,), jnp.float32)
    return p


def _pack_cols(chunks, align=LANES):
    """Concatenate 2-D chunks (same row count) along columns; every chunk starts at a
    lane-aligned column.  Returns (packed_array, column_offsets)."""
    rows = chunks[0].shape[0]
    parts, offs, c = [], [], 0
    for m in chunks:
        m = jnp.asarray(m, jnp.float32)
        gap = (-c) % align
        if gap:
            parts.append(jnp.zeros((rows, gap), jnp.float32))
            c += gap
        offs.append(c)
        parts.append(m)
        c += m.shape[1]
    return jnp.concatenate(parts, axis=1), tuple(offs)


def _pack_rows(chunks, ncols):
    """Stack 2-D chunks contiguously into one (rows, ncols) array (no sublane padding:
    static single-row slices do not need 8-row alignment).  Returns (array, row_offsets)."""
    parts, offs, r = [], [], 0
    for m in chunks:
        m = jnp.asarray(m, jnp.float32)
        if m.ndim == 1:
            m = m[None, :]
        offs.append(r)
        parts.append(jnp.pad(m, ((0, 0), (0, ncols - m.shape[1]))))
        r += m.shape[0]
    return jnp.concatenate(parts, axis=0), tuple(offs)


def transam_forward(src, params, *, num_heads=NUM_HEADS, kernel_size=KERNEL_SIZE,
                    stride=STRIDE, block_b=None):
    S_in, B, F_in = src.shape
    D = (F_in - 1) // stride + 1               # conv output along feature axis = d_model
    T = (S_in - kernel_size) // stride + 1     # conv output along sequence axis
    H = num_heads
    FF = params['w1'].shape[0]
    assert D % H == 0, "d_model must be divisible by the number of heads"

    if block_b is None:
        block_b = max(1, LANES // D)           # whole batch elements per 128-lane vreg
    pad_b = (-B) % block_b
    if pad_b:
        src = jnp.concatenate([src, jnp.zeros((S_in, pad_b, F_in), src.dtype)], axis=1)
    Bp = B + pad_b
    num_steps = Bp // block_b
    BD = block_b * D
    dh = D // H

    # per-step input slab: lane index = (batch-in-block)*D + feature  (8*16 = 128 lanes)
    xs = jnp.transpose(src[:, :, ::stride], (1, 0, 2)).astype(jnp.float32)   # (Bp, S_in, D)
    xs = (xs.reshape(num_steps, block_b, S_in, D)
            .transpose(0, 2, 1, 3)
            .reshape(num_steps, S_in, BD))

    # Conv2d along the sequence axis as an im2col weight matrix (shared across batch)
    conv_w = params['conv_w'].astype(jnp.float32)
    wconv = jnp.zeros((T, S_in), jnp.float32)
    for t in range(T):
        wconv = wconv.at[t, t * stride:t * stride + kernel_size].set(conv_w)

    pe_plus = positional_encoding(T, D) + params['conv_b'].reshape(())       # conv bias folded in
    pe_tiled = jnp.tile(pe_plus, (1, block_b))                               # (T, BD)

    # 0/1 helper matrices so segmented (batch, head) reductions run on the MXU
    lane = jnp.arange(BD)
    col = jnp.arange(block_b * H)
    grp = ((lane[:, None] // D == col[None, :] // H) &
           ((lane[:, None] % D) // dh == col[None, :] % H)).astype(jnp.float32)   # (BD, BB*H)
    gln = (lane[:, None] // D == lane[None, :] // D).astype(jnp.float32)           # (BD, BD)

    def bd(w):   # block-diagonal replicate a per-batch weight across the batch lanes
        r, c = w.shape
        return (jnp.eye(block_b, dtype=jnp.float32)[:, None, :, None]
                * jnp.asarray(w, jnp.float32)[None, :, None, :]).reshape(block_b * r,
                                                                         block_b * c)

    w_qkv = params['w_qkv'].astype(jnp.float32)
    wq_bd = bd(w_qkv[0:D, :].T)                # lane-aligned, separate Q / K / V chunks
    wk_bd = bd(w_qkv[D:2 * D, :].T)
    wv_bd = bd(w_qkv[2 * D:3 * D, :].T)
    wo_bd = bd(params['w_o'].T)
    w1_bd = bd(params['w1'].T)                 # (BD, BB*FF)
    w2_bd = bd(params['w2'].T)                 # (BB*FF, BD)
    wdec_bd = bd(params['w_dec'].T)            # (BD, BB)

    def tile_b(v, reps=block_b):
        return jnp.tile(jnp.asarray(v, jnp.float32).reshape(1, -1), (1, reps))

    # ---- consolidated operands: input slab + packed weights + w2 + packed consts ----
    wmat, wcol = _pack_cols([wq_bd, wk_bd, wv_bd, wo_bd, grp, gln, w1_bd, wdec_bd])
    ncols = max(S_in, BD, block_b * FF)
    consts, crow = _pack_rows(
        [wconv, pe_tiled,
         tile_b(params['b_qkv'][0:D]), tile_b(params['b_qkv'][D:2 * D]),
         tile_b(params['b_qkv'][2 * D:3 * D]), tile_b(params['b_o']),
         tile_b(params['g1']), tile_b(params['be1']),
         tile_b(params['b1']), tile_b(params['b2']),
         tile_b(params['g2']), tile_b(params['be2']),
         tile_b(params['b_dec'])],
        ncols)

    kernel = partial(_transam_kernel, T, D, H, FF, S_in, block_b, wcol, crow)
    out = pl.pallas_call(
        kernel,
        grid=(num_steps,),
        out_shape=jax.ShapeDtypeStruct((num_steps, 1, block_b), jnp.float32),
        in_specs=[
            pl.BlockSpec((1, S_in, BD), lambda i: (i, 0, 0)),   # per-step batch slab
            pl.BlockSpec(wmat.shape, lambda i: (0, 0)),         # resident packed weights
            pl.BlockSpec(w2_bd.shape, lambda i: (0, 0)),
            pl.BlockSpec(consts.shape, lambda i: (0, 0)),
        ],
        out_specs=pl.BlockSpec((1, 1, block_b), lambda i: (i, 0, 0)),   # lane-dense output
        compiler_params=pltpu.CompilerParams(
            dimension_semantics=("parallel",)),   # even step count -> both v7x TensorCores
    )(xs, wmat, w2_bd, consts)
    return out.reshape(Bp, 1)[:B]


def transam_reference(src, params, *, num_heads=NUM_HEADS,
                      kernel_size=KERNEL_SIZE, stride=STRIDE):
    """Plain-JAX reference mirroring the PyTorch forward (eval mode)."""
    S_in, B, F_in = src.shape
    D = (F_in - 1) // stride + 1
    T = (S_in - kernel_size) // stride + 1
    K, H = kernel_size, num_heads
    dh = D // H

    x = jnp.transpose(src, (1, 2, 0))[:, ::stride, :]
    wins = jnp.stack([x[:, :, t * stride:t * stride + K] for t in range(T)], axis=1)
    conv = jnp.einsum('btdk,k->btd', wins, params['conv_w']) + params['conv_b'][0, 0]
    z = conv + positional_encoding(T, D)[None, :, :]               # (B, T, D)

    qkv = z @ params['w_qkv'].T + params['b_qkv']
    q, k, v = qkv[..., :D], qkv[..., D:2 * D], qkv[..., 2 * D:]
    q = q.reshape(B, T, H, dh) / math.sqrt(dh)
    k = k.reshape(B, T, H, dh)
    v = v.reshape(B, T, H, dh)
    s = jnp.einsum('bthd,bshd->bhts', q, k)
    p = jax.nn.softmax(s, axis=-1)
    o = jnp.einsum('bhts,bshd->bthd', p, v).reshape(B, T, D)
    attn = o @ params['w_o'].T + params['b_o']

    def ln(u, g, b):
        mu = u.mean(-1, keepdims=True)
        var = ((u - mu) ** 2).mean(-1, keepdims=True)
        return (u - mu) / jnp.sqrt(var + LN_EPS) * g + b

    y = ln(z + attn, params['g1'], params['be1'])
    ff = jnp.maximum(y @ params['w1'].T + params['b1'], 0.0) @ params['w2'].T + params['b2']
    y2 = ln(y + ff, params['g2'], params['be2'])
    last = y2[:, -1, :]
    return last @ params['w_dec'].T + params['b_dec']


if __name__ == "__main__":
    key = jax.random.PRNGKey(0)
    k_src, k_par = jax.random.split(key)

    # src: (seq_len, batch, features) — Conv2d((1,16), stride=8) gives
    # d_model = (features-1)//8 + 1 = 16 and seq' = (seq-16)//8 + 1 = 4.
    # batch=16 -> 2 grid steps of 8 batch elements each (8*16 = 128 lanes per step,
    # and an even step count for v7x's two TensorCores).
    S_in, B, F_in = 40, 16, 128
    src = jax.random.normal(k_src, (S_in, B, F_in), jnp.float32)

    D = (F_in - 1) // STRIDE + 1
    params = init_params(k_par, D, KERNEL_SIZE, DIM_FF)

    out = transam_forward(src, params)
    out = jax.block_until_ready(out)

    ref = transam_reference(src, params)
    assert out.shape == (B, 1)
    err = float(jnp.max(jnp.abs(out - ref)))
    if not err < 1e-2:
        raise AssertionError(f"kernel/reference mismatch: max abs err = {err}")
    print("KERNEL_OK")
</pallas_src>

<mosaic_0001>
module attributes {stable_mosaic.version = 11 : i64} {
  func.func @_transam_kernel(%arg0: i32, %arg1: memref<1x40x128xf32, #tpu.memory_space<vmem>>, %arg2: memref<128x1032xf32, #tpu.memory_space<vmem>>, %arg3: memref<256x128xf32, #tpu.memory_space<vmem>>, %arg4: memref<19x256xf32, #tpu.memory_space<vmem>>, %arg5: memref<1x1x8xf32, #tpu.memory_space<vmem>>) attributes {dimension_semantics = [#tpu.dimension_semantics<parallel>], iteration_bounds = array<i64: 2>, scalar_prefetch = 0 : i64, scratch_operands = 0 : i64, tpu.core_type = #tpu.core_type<tc>, window_params = [{transform_indices = @transform_0, window_bounds = array<i64: 1, 40, 128>}, {pipeline_mode = #tpu.pipeline_mode<synchronous>, transform_indices = @transform_1, window_bounds = array<i64: 128, 1032>}, {pipeline_mode = #tpu.pipeline_mode<synchronous>, transform_indices = @transform_2, window_bounds = array<i64: 256, 128>}, {pipeline_mode = #tpu.pipeline_mode<synchronous>, transform_indices = @transform_3, window_bounds = array<i64: 19, 256>}, {transform_indices = @transform_4, window_bounds = array<i64: 1, 1, 8>}]} {
    %c0 = arith.constant 0 : index
    %c0_0 = arith.constant 0 : index
    %c0_1 = arith.constant 0 : index
    %0 = vector.load %arg1[%c0, %c0_0, %c0_1] : memref<1x40x128xf32, #tpu.memory_space<vmem>>, vector<1x40x128xf32>
    %1 = vector.shape_cast %0 : vector<1x40x128xf32> to vector<40x128xf32>
    %c0_2 = arith.constant 0 : index
    %c0_3 = arith.constant 0 : index
    %2 = vector.load %arg4[%c0_2, %c0_3] : memref<19x256xf32, #tpu.memory_space<vmem>>, vector<4x40xf32>
    %c4 = arith.constant 4 : index
    %c0_4 = arith.constant 0 : index
    %3 = vector.load %arg4[%c4, %c0_4] : memref<19x256xf32, #tpu.memory_space<vmem>>, vector<4x128xf32>
    %c8 = arith.constant 8 : index
    %c0_5 = arith.constant 0 : index
    %4 = vector.load %arg4[%c8, %c0_5] : memref<19x256xf32, #tpu.memory_space<vmem>>, vector<1x128xf32>
    %c9 = arith.constant 9 : index
    %c0_6 = arith.constant 0 : index
    %5 = vector.load %arg4[%c9, %c0_6] : memref<19x256xf32, #tpu.memory_space<vmem>>, vector<1x128xf32>
    %c10 = arith.constant 10 : index
    %c0_7 = arith.constant 0 : index
    %6 = vector.load %arg4[%c10, %c0_7] : memref<19x256xf32, #tpu.memory_space<vmem>>, vector<1x128xf32>
    %c11 = arith.constant 11 : index
    %c0_8 = arith.constant 0 : index
    %7 = vector.load %arg4[%c11, %c0_8] : memref<19x256xf32, #tpu.memory_space<vmem>>, vector<1x128xf32>
    %c12 = arith.constant 12 : index
    %c0_9 = arith.constant 0 : index
    %8 = vector.load %arg4[%c12, %c0_9] : memref<19x256xf32, #tpu.memory_space<vmem>>, vector<1x128xf32>
    %c13 = arith.constant 13 : index
    %c0_10 = arith.constant 0 : index
    %9 = vector.load %arg4[%c13, %c0_10] : memref<19x256xf32, #tpu.memory_space<vmem>>, vector<1x128xf32>
    %c14 = arith.constant 14 : index
    %c0_11 = arith.constant 0 : index
    %10 = vector.load %arg4[%c14, %c0_11] : memref<19x256xf32, #tpu.memory_space<vmem>>, vector<1x256xf32>
    %c15 = arith.constant 15 : index
    %c0_12 = arith.constant 0 : index
    %11 = vector.load %arg4[%c15, %c0_12] : memref<19x256xf32, #tpu.memory_space<vmem>>, vector<1x128xf32>
    %c16 = arith.constant 16 : index
    %c0_13 = arith.constant 0 : index
    %12 = vector.load %arg4[%c16, %c0_13] : memref<19x256xf32, #tpu.memory_space<vmem>>, vector<1x128xf32>
    %c17 = arith.constant 17 : index
    %c0_14 = arith.constant 0 : index
    %13 = vector.load %arg4[%c17, %c0_14] : memref<19x256xf32, #tpu.memory_space<vmem>>, vector<1x128xf32>
    %c18 = arith.constant 18 : index
    %c0_15 = arith.constant 0 : index
    %14 = vector.load %arg4[%c18, %c0_15] : memref<19x256xf32, #tpu.memory_space<vmem>>, vector<1x8xf32>
    %c0_16 = arith.constant 0 : index
    %c0_17 = arith.constant 0 : index
    %15 = vector.load %arg2[%c0_16, %c0_17] : memref<128x1032xf32, #tpu.memory_space<vmem>>, vector<128x128xf32>
    %c0_18 = arith.constant 0 : index
    %c128 = arith.constant 128 : index
    %16 = vector.load %arg2[%c0_18, %c128] : memref<128x1032xf32, #tpu.memory_space<vmem>>, vector<128x128xf32>
    %c0_19 = arith.constant 0 : index
    %c256 = arith.constant 256 : index
    %17 = vector.load %arg2[%c0_19, %c256] : memref<128x1032xf32, #tpu.memory_space<vmem>>, vector<128x128xf32>
    %c0_20 = arith.constant 0 : index
    %c384 = arith.constant 384 : index
    %18 = vector.load %arg2[%c0_20, %c384] : memref<128x1032xf32, #tpu.memory_space<vmem>>, vector<128x128xf32>
    %c0_21 = arith.constant 0 : index
    %c512 = arith.constant 512 : index
    %19 = vector.load %arg2[%c0_21, %c512] : memref<128x1032xf32, #tpu.memory_space<vmem>>, vector<128x32xf32>
    %c0_22 = arith.constant 0 : index
    %c640 = arith.constant 640 : index
    %20 = vector.load %arg2[%c0_22, %c640] : memref<128x1032xf32, #tpu.memory_space<vmem>>, vector<128x128xf32>
    %c0_23 = arith.constant 0 : index
    %c768 = arith.constant 768 : index
    %21 = vector.load %arg2[%c0_23, %c768] : memref<128x1032xf32, #tpu.memory_space<vmem>>, vector<128x256xf32>
    %c0_24 = arith.constant 0 : index
    %c1024 = arith.constant 1024 : index
    %22 = vector.load %arg2[%c0_24, %c1024] : memref<128x1032xf32, #tpu.memory_space<vmem>>, vector<128x8xf32>
    %c0_25 = arith.constant 0 : index
    %c0_26 = arith.constant 0 : index
    %23 = vector.load %arg3[%c0_25, %c0_26] : memref<256x128xf32, #tpu.memory_space<vmem>>, vector<256x128xf32>
    %cst = arith.constant dense<0.000000e+00> : vector<4x128xf32>
    %24 = tpu.matmul %2, %1, %cst {dimension_numbers = #tpu.dot_dimension_numbers<[1], [0], [0], [1], [0, 0, 1, 1], [], []>} : vector<4x40xf32>, vector<40x128xf32>, vector<4x128xf32> -> vector<4x128xf32>
    %25 = arith.addf %24, %3 : vector<4x128xf32>
    %26 = vector.extract_strided_slice %25 {offsets = [3, 0], sizes = [1, 128], strides = [1, 1]} : vector<4x128xf32> to vector<1x128xf32>
    %cst_27 = arith.constant dense<0.000000e+00> : vector<4x128xf32>
    %27 = tpu.matmul %25, %16, %cst_27 {dimension_numbers = #tpu.dot_dimension_numbers<[1], [0], [0], [1], [0, 0, 1, 1], [], []>} : vector<4x128xf32>, vector<128x128xf32>, vector<4x128xf32> -> vector<4x128xf32>
    %28 = vector.broadcast %5 : vector<1x128xf32> to vector<4x128xf32>
    %29 = arith.addf %27, %28 : vector<4x128xf32>
    %cst_28 = arith.constant dense<0.000000e+00> : vector<4x128xf32>
    %30 = tpu.matmul %25, %17, %cst_28 {dimension_numbers = #tpu.dot_dimension_numbers<[1], [0], [0], [1], [0, 0, 1, 1], [], []>} : vector<4x128xf32>, vector<128x128xf32>, vector<4x128xf32> -> vector<4x128xf32>
    %31 = vector.broadcast %6 : vector<1x128xf32> to vector<4x128xf32>
    %32 = arith.addf %30, %31 : vector<4x128xf32>
    %cst_29 = arith.constant dense<0.000000e+00> : vector<1x128xf32>
    %33 = tpu.matmul %26, %15, %cst_29 {dimension_numbers = #tpu.dot_dimension_numbers<[1], [0], [0], [1], [0, 0, 1, 1], [], []>} : vector<1x128xf32>, vector<128x128xf32>, vector<1x128xf32> -> vector<1x128xf32>
    %34 = arith.addf %33, %4 : vector<1x128xf32>
    %cst_30 = arith.constant 5.000000e-01 : f32
    %35 = vector.broadcast %cst_30 : f32 to vector<1x128xf32>
    %36 = arith.mulf %34, %35 : vector<1x128xf32>
    %37 = vector.broadcast %36 : vector<1x128xf32> to vector<4x128xf32>
    %38 = arith.mulf %29, %37 : vector<4x128xf32>
    %cst_31 = arith.constant dense<0.000000e+00> : vector<4x32xf32>
    %39 = tpu.matmul %38, %19, %cst_31 {dimension_numbers = #tpu.dot_dimension_numbers<[1], [0], [0], [1], [0, 0, 1, 1], [], []>} : vector<4x128xf32>, vector<128x32xf32>, vector<4x32xf32> -> vector<4x32xf32>
    %cst_32 = arith.constant dense<0xFF800000> : vector<32xf32>
    %40 = vector.multi_reduction <maximumf>, %39, %cst_32 [0] : vector<4x32xf32> to vector<32xf32>
    %41 = vector.shape_cast %40 : vector<32xf32> to vector<1x32xf32>
    %42 = vector.broadcast %41 : vector<1x32xf32> to vector<4x32xf32>
    %43 = arith.subf %39, %42 : vector<4x32xf32>
    %44 = math.exp %43 : vector<4x32xf32>
    %cst_33 = arith.constant dense<0.000000e+00> : vector<32xf32>
    %45 = vector.multi_reduction <add>, %44, %cst_33 [0] : vector<4x32xf32> to vector<32xf32>
    %46 = vector.shape_cast %45 : vector<32xf32> to vector<1x32xf32>
    %47 = vector.broadcast %46 : vector<1x32xf32> to vector<4x32xf32>
    %48 = arith.divf %44, %47 : vector<4x32xf32>
    %cst_34 = arith.constant dense<0.000000e+00> : vector<4x128xf32>
    %49 = tpu.matmul %48, %19, %cst_34 {dimension_numbers = #tpu.dot_dimension_numbers<[1], [1], [0], [0], [0, 0, 1, 0], [], []>} : vector<4x32xf32>, vector<128x32xf32>, vector<4x128xf32> -> vector<4x128xf32>
    %50 = arith.mulf %49, %32 : vector<4x128xf32>
    %cst_35 = arith.constant dense<0.000000e+00> : vector<128xf32>
    %51 = vector.multi_reduction <add>, %50, %cst_35 [0] : vector<4x128xf32> to vector<128xf32>
    %52 = vector.shape_cast %51 : vector<128xf32> to vector<1x128xf32>
    %cst_36 = arith.constant dense<0.000000e+00> : vector<1x128xf32>
    %53 = tpu.matmul %52, %18, %cst_36 {dimension_numbers = #tpu.dot_dimension_numbers<[1], [0], [0], [1], [0, 0, 1, 1], [], []>} : vector<1x128xf32>, vector<128x128xf32>, vector<1x128xf32> -> vector<1x128xf32>
    %54 = arith.addf %53, %7 : vector<1x128xf32>
    %55 = arith.addf %26, %54 : vector<1x128xf32>
    %cst_37 = arith.constant dense<0.000000e+00> : vector<1x128xf32>
    %56 = tpu.matmul %55, %20, %cst_37 {dimension_numbers = #tpu.dot_dimension_numbers<[1], [0], [0], [1], [0, 0, 1, 1], [], []>} : vector<1x128xf32>, vector<128x128xf32>, vector<1x128xf32> -> vector<1x128xf32>
    %cst_38 = arith.constant 6.250000e-02 : f32
    %57 = vector.broadcast %cst_38 : f32 to vector<1x128xf32>
    %58 = arith.mulf %56, %57 : vector<1x128xf32>
    %59 = arith.subf %55, %58 : vector<1x128xf32>
    %60 = arith.mulf %59, %59 : vector<1x128xf32>
    %cst_39 = arith.constant dense<0.000000e+00> : vector<1x128xf32>
    %61 = tpu.matmul %60, %20, %cst_39 {dimension_numbers = #tpu.dot_dimension_numbers<[1], [0], [0], [1], [0, 0, 1, 1], [], []>} : vector<1x128xf32>, vector<128x128xf32>, vector<1x128xf32> -> vector<1x128xf32>
    %cst_40 = arith.constant 6.250000e-02 : f32
    %62 = vector.broadcast %cst_40 : f32 to vector<1x128xf32>
    %63 = arith.mulf %61, %62 : vector<1x128xf32>
    %cst_41 = arith.constant 9.99999974E-6 : f32
    %64 = vector.broadcast %cst_41 : f32 to vector<1x128xf32>
    %65 = arith.addf %63, %64 : vector<1x128xf32>
    %66 = math.rsqrt %65 : vector<1x128xf32>
    %67 = arith.mulf %59, %66 : vector<1x128xf32>
    %68 = arith.mulf %67, %8 : vector<1x128xf32>
    %69 = arith.addf %68, %9 : vector<1x128xf32>
    %cst_42 = arith.constant dense<0.000000e+00> : vector<1x256xf32>
    %70 = tpu.matmul %69, %21, %cst_42 {dimension_numbers = #tpu.dot_dimension_numbers<[1], [0], [0], [1], [0, 0, 1, 1], [], []>} : vector<1x128xf32>, vector<128x256xf32>, vector<1x256xf32> -> vector<1x256xf32>
    %71 = arith.addf %70, %10 : vector<1x256xf32>
    %cst_43 = arith.constant 0.000000e+00 : f32
    %72 = vector.broadcast %cst_43 : f32 to vector<1x256xf32>
    %73 = arith.maximumf %71, %72 : vector<1x256xf32>
    %cst_44 = arith.constant dense<0.000000e+00> : vector<1x128xf32>
    %74 = tpu.matmul %73, %23, %cst_44 {dimension_numbers = #tpu.dot_dimension_numbers<[1], [0], [0], [1], [0, 0, 1, 1], [], []>} : vector<1x256xf32>, vector<256x128xf32>, vector<1x128xf32> -> vector<1x128xf32>
    %75 = arith.addf %74, %11 : vector<1x128xf32>
    %76 = arith.addf %69, %75 : vector<1x128xf32>
    %cst_45 = arith.constant dense<0.000000e+00> : vector<1x128xf32>
    %77 = tpu.matmul %76, %20, %cst_45 {dimension_numbers = #tpu.dot_dimension_numbers<[1], [0], [0], [1], [0, 0, 1, 1], [], []>} : vector<1x128xf32>, vector<128x128xf32>, vector<1x128xf32> -> vector<1x128xf32>
    %cst_46 = arith.constant 6.250000e-02 : f32
    %78 = vector.broadcast %cst_46 : f32 to vector<1x128xf32>
    %79 = arith.mulf %77, %78 : vector<1x128xf32>
    %80 = arith.subf %76, %79 : vector<1x128xf32>
    %81 = arith.mulf %80, %80 : vector<1x128xf32>
    %cst_47 = arith.constant dense<0.000000e+00> : vector<1x128xf32>
    %82 = tpu.matmul %81, %20, %cst_47 {dimension_numbers = #tpu.dot_dimension_numbers<[1], [0], [0], [1], [0, 0, 1, 1], [], []>} : vector<1x128xf32>, vector<128x128xf32>, vector<1x128xf32> -> vector<1x128xf32>
    %cst_48 = arith.constant 6.250000e-02 : f32
    %83 = vector.broadcast %cst_48 : f32 to vector<1x128xf32>
    %84 = arith.mulf %82, %83 : vector<1x128xf32>
    %cst_49 = arith.constant 9.99999974E-6 : f32
    %85 = vector.broadcast %cst_49 : f32 to vector<1x128xf32>
    %86 = arith.addf %84, %85 : vector<1x128xf32>
    %87 = math.rsqrt %86 : vector<1x128xf32>
    %88 = arith.mulf %80, %87 : vector<1x128xf32>
    %89 = arith.mulf %88, %12 : vector<1x128xf32>
    %90 = arith.addf %89, %13 : vector<1x128xf32>
    %cst_50 = arith.constant dense<0.000000e+00> : vector<1x8xf32>
    %91 = tpu.matmul %90, %22, %cst_50 {dimension_numbers = #tpu.dot_dimension_numbers<[1], [0], [0], [1], [0, 0, 1, 1], [], []>} : vector<1x128xf32>, vector<128x8xf32>, vector<1x8xf32> -> vector<1x8xf32>
    %92 = arith.addf %91, %14 : vector<1x8xf32>
    %93 = vector.shape_cast %92 : vector<1x8xf32> to vector<1x1x8xf32>
    %c0_51 = arith.constant 0 : index
    %c0_52 = arith.constant 0 : index
    %c0_53 = arith.constant 0 : index
    %94 = vector.load %arg5[%c0_51, %c0_52, %c0_53] : memref<1x1x8xf32, #tpu.memory_space<vmem>>, vector<1x1x8xf32>
    tpu.vector_store %arg5[%c0_51, %c0_52, %c0_53], %93 {strides = array<i32>} : memref<1x1x8xf32, #tpu.memory_space<vmem>>, vector<1x1x8xf32>,
    return
  }
  func.func @transform_0(%arg0: i32) -> (i32, i32, i32) {
    %c0_i32 = arith.constant 0 : i32
    %c0_i32_0 = arith.constant 0 : i32
    %c0_i32_1 = arith.constant 0 : i32
    return %arg0, %c0_i32, %c0_i32_0 : i32, i32, i32
  }
  func.func @transform_1(%arg0: i32) -> (i32, i32) {
    %c0_i32 = arith.constant 0 : i32
    %c0_i32_0 = arith.constant 0 : i32
    %c0_i32_1 = arith.constant 0 : i32
    return %c0_i32, %c0_i32_0 : i32, i32
  }
  func.func @transform_2(%arg0: i32) -> (i32, i32) {
    %c0_i32 = arith.constant 0 : i32
    %c0_i32_0 = arith.constant 0 : i32
    %c0_i32_1 = arith.constant 0 : i32
    return %c0_i32, %c0_i32_0 : i32, i32
  }
  func.func @transform_3(%arg0: i32) -> (i32, i32) {
    %c0_i32 = arith.constant 0 : i32
    %c0_i32_0 = arith.constant 0 : i32
    %c0_i32_1 = arith.constant 0 : i32
    return %c0_i32, %c0_i32_0 : i32, i32
  }
  func.func @transform_4(%arg0: i32) -> (i32, i32, i32) {
    %c0_i32 = arith.constant 0 : i32
    %c0_i32_0 = arith.constant 0 : i32
    %c0_i32_1 = arith.constant 0 : i32
    return %arg0, %c0_i32, %c0_i32_0 : i32, i32, i32
  }
}

</mosaic_0001>

<bundles_post_ra>
// kernel: tpu_custom_call.1
= control target key start
LH: loop header
LB: loop body
LE: loop exit
PB: predicated region body
PF: predicated region fallthrough
CT: control target
= control target key end

     0   :  { %9 = vsyncpa [#allocation3], 0  ;;  %s1912_s0 = inlined_call_operand.vmem [shape: f32[2,40,128], index: 0, kind: input, shape index: {}]   ;;  %s1913_s1 = inlined_call_operand.vmem [shape: f32[128,1032], index: 1, kind: input, shape index: {}]   ;;  %s1914_s2 = inlined_call_operand.vmem [shape: f32[256,128], index: 2, kind: input, shape index: {}]   ;;  %s1915_s3 = inlined_call_operand.vmem [shape: f32[19,256], index: 3, kind: input, shape index: {}]   ;;  %s1916_s4 = inlined_call_operand.hbm [shape: f32[2,1,8], index: 4, kind: output, shape index: {}]  }
   0x1   :  { %11 = vsyncpa [#allocation3 + $0x1], 0  ;;  %s1131_s15 = smov 0   ;;  %s1133_s16 = smov 0  }
   0x2   :  { %s1135_s17 = smov 0   ;;  %s1137_s18 = smov 0  }
   0x3 LB: > { %s1152_s19 = sadd.s32 4294967295, %s1104_s18   ;;  %s968_s20 = sadd.s32 4294967294, %s1104_s18   ;;  %s1104_s18 = sphi %s1137_s18, %s1922_s18   ;;  %s1100_s17 = sphi %s1135_s17, %s1921_s17   ;;  %s1096_s16 = sphi %s1133_s16, %s1920_s16   ;;  %s1092_s15 = sphi %s1131_s15, %s1919_s15  }
   0x4   : > { %s1156_s21 = sadd.s32 1, %s1104_s18   ;;  %s113_s22 = sadd.s32 1, %s1100_s17 }
   0x5   : > { %s110_s23 = ssub.s32 %s1104_s18, %s1156_s21  ;;  %p123_p0 = scmp.ne.s32.totalorder %s1100_s17, %s1096_s16 }
   0x6   : > { %p111_p1 = scmp.eq.s32.totalorder %s110_s23, 0  ;;  %p124_p2 = scmp.eq.s32.totalorder %s1152_s19, 1 }
   0x7   : > { %p129_p3 = scmp.ne.s32.totalorder %s1096_s16, %s1092_s15  ;;  %p130_p4 = scmp.eq.s32.totalorder %s968_s20, 1 }
   0x8   : > { %s1167_s24 = scalar_select %p111_p1, %s1100_s17, %s113_s22  }
   0x9   : > { %p1169_p5 = por %p124_p2, %p123_p0  ;;  %p1173_p6 = por %p130_p4, %p129_p3 }
   0xa   : > { %p971_p7 = scmp.ge.s32.totalorder %s1104_s18, 1  ;;  %p165_p8 = scmp.lt.s32.totalorder %s1104_s18, 3 }
   0xc   : > { %p166_p9 = pnand %p971_p7, %p165_p8 }
   0xd   : > { %p190_p10 = scmp.lt.s32.totalorder (!%p166_p9), %s1152_s19, 1  ;;  %s188_s8 = sand.u32 (!%p166_p9), 1, %s1096_s16  }
   0xe   : > { %169 = sbr.rel (%p166_p9) target bundleno = 1777 (0x6f1), region = 36  ;;  %s909_s12 = scalar_lea.hbm (!%p166_p9), %s1916_s4, %s1152_s19 }
   0xf   : > { %s189_s20 = scalar_lea.vmem (!%p166_p9), [#allocation2], %s188_s8  ;;  %s913_s23 = sshll.u32 (!%p166_p9), %s909_s12, 4  ;;  %s914_s23 = int_to_ptr.hbm [resolvable:$true] %s913_s23 }
  0x10   : > { %s911_s22 = sshll.u32 (!%p166_p9), %s189_s20, 4  ;;  %s901_s27 = scalar_lea.sflag (!%p166_p9), [#allocation3], %s188_s8  ;;  %s912_s22 = int_to_ptr.vmem [resolvable:$true] %s911_s22 }
  0x11   : > { %s1056_s28 = sshra.s32 (!%p166_p9), %s914_s23, 4  ;;  %s1062_s5 = scalar_lea.hbm (!%p166_p9), %s1916_s4, 2  ;;  %s1057_s28 = int_to_ptr.hbm [resolvable:$true] %s1056_s28 }
  0x12   : > { %p1063_p0 = scmp.lt.s32.totalorder (!%p166_p9), %s1057_s28, %s1916_s4 }
  0x13   : > { %v245_v0 = vld [vmem:[%s1913_s1 + $0x440] sm:$0xff]  ;;  %v261_v1 = vld [vmem:[%s1913_s1 + $0x448] sm:$0xff]  ;;  %v244_v2 = vld [vmem:[%s1913_s1 + $0x3f8] sm:$0xff]  ;;  %s191_s11 = scalar_select %p190_p10, %s1152_s19, 1  ;;  %vm393_vm0 = vcmask 326656   ;;  %vm536_vm1 = vcmask 261120  }
  0x14   : > { %417 = vmatpush.msra.mxu1 %v245_v0  ;;  %437 = vmatpush.msra.mxu2 %v261_v1  ;;  %v260_v3 = vld [vmem:[%s1913_s1 + $0x400] sm:$0xff]  ;;  %v229_v4 = vld [vmem:[%s1913_s1 + $0x438] sm:$0xff]  ;;  %v243_v5 = vld [vmem:[%s1913_s1 + $0x3b0] sm:$0xff]  ;;  %vm503_vm2 = vcmask 257024   ;;  %vm609_vm7 = vcmask 1043456   ;;  %vm898_vm14 = vcmask 57344  }
  0x15   : > { %460 = vmatpush.msra.mxu3 %v229_v4  ;;  %v259_v6 = vld [vmem:[%s1913_s1 + $0x3b8] sm:$0xff]  ;;  %v228_v7 = vld [vmem:[%s1913_s1 + $0x3f0] sm:$0xff]  ;;  %v227_v8 = vld [vmem:[%s1913_s1 + $0x3a8] sm:$0xff]  ;;  %s994_s29 = smul.u32 40, %s191_s11 }
  0x16   : > { %418 = vmatpush.msra.mxu1 %v244_v2  ;;  %438 = vmatpush.msra.mxu2 %v260_v3  ;;  %v242_v9 = vld [vmem:[%s1913_s1 + $0x368] sm:$0xff]  ;;  %v258_v10 = vld [vmem:[%s1913_s1 + $0x370] sm:$0xff]  ;;  %v226_v11 = vld [vmem:[%s1913_s1 + $0x360] sm:$0xff] }
  0x17   : > { %461 = vmatpush.msra.mxu3 %v228_v7  ;;  %s194_s13 = scalar_lea.vmem %s1912_s0, %s994_s29  ;;  %v241_v12 = vld [vmem:[%s1913_s1 + $0x320] sm:$0xff]  ;;  %v257_v13 = vld [vmem:[%s1913_s1 + $0x328] sm:$0xff]  ;;  %v225_v16 = vld [vmem:[%s1913_s1 + $0x318] sm:$0xff]  ;;  %s1058_s29 = scalar_lea.hbm %s1057_s28, 1 }
  0x18   : > { %419 = vmatpush.msra.mxu1 %v243_v5  ;;  %439 = vmatpush.msra.mxu2 %v259_v6  ;;  %v199_v14 = vld [vmem:[%s194_s13 + $0x20] sm:$0xff]  ;;  %v198_v15 = vld [vmem:[%s194_s13 + $0x18] sm:$0xff]  ;;  %v197_v19 = vld [vmem:[%s194_s13 + $0x10] sm:$0xff]  ;;  %p1059_p11 = scmp.ne.s32.totalorder %s1057_s28, %s1058_s29  ;;  %p1064_p1 = scmp.lt.s32.totalorder %s1062_s5, %s1058_s29 }
  0x19   : > { %462 = vmatpush.msra.mxu3 %v227_v8  ;;  %408 = vmatpush.msra.mxu0 %v199_v14  ;;  %v240_v17 = vld [vmem:[%s1913_s1 + $0x2d8] sm:$0xff]  ;;  %v256_v18 = vld [vmem:[%s1913_s1 + $0x2e0] sm:$0xff]  ;;  %v224_v20 = vld [vmem:[%s1913_s1 + $0x2d0] sm:$0xff] }
  0x1a   : > { %420 = vmatpush.msra.mxu1 %v242_v9  ;;  %440 = vmatpush.msra.mxu2 %v258_v10  ;;  %v239_v21 = vld [vmem:[%s1913_s1 + $0x290] sm:$0xff]  ;;  %v255_v22 = vld [vmem:[%s1913_s1 + $0x298] sm:$0xff]  ;;  %v196_v23 = vld [vmem:[%s194_s13 + $0x8] sm:$0xff]  ;;  %p1060_p12 = pnand %p1059_p11, %p1169_p5  ;;  %p1065_p2 = por %p1064_p1, %p1063_p0 }
  0x1b   : > { %463 = vmatpush.msra.mxu3 %v226_v11  ;;  %409 = vmatpush.msra.mxu0 %v198_v15  ;;  %v223_v24 = vld [vmem:[%s1913_s1 + $0x288] sm:$0xff]  ;;  %v254_v26 = vld [vmem:[%s1913_s1 + $0x250] sm:$0xff]  ;;  %v195_v27 = vld [vmem:[%s194_s13] sm:$0xff] }
  0x1c   : > { %421 = vmatpush.msra.mxu1 %v241_v12  ;;  %441 = vmatpush.msra.mxu2 %v257_v13  ;;  %v238_v25 = vld [vmem:[%s1913_s1 + $0x248] sm:$0xff]  ;;  %v222_v28 = vld [vmem:[%s1913_s1 + $0x240] sm:$0xff]  ;;  %v221_v32 = vld [vmem:[%s1913_s1 + $0x1f8] sm:$0xff]  ;;  %p1061_p13 = pneg %p1060_p12 }
  0x1d   : > { %464 = vmatpush.msra.mxu3 %v225_v16  ;;  %410 = vmatpush.msra.mxu0 %v197_v19  ;;  %v200_v29 = vld [vmem:[%s1915_s3] sm:$0xf]  ;;  %v253_v31 = vld [vmem:[%s1913_s1 + $0x208] sm:$0xff]  ;;  %v236_v33 = vld [vmem:[%s1913_s1 + $0x1b8] sm:$0xff] }
  0x1e   : > { %422 = vmatpush.msra.mxu1 %v240_v17  ;;  %442 = vmatpush.msra.mxu2 %v256_v18  ;;  %v237_v30 = vld [vmem:[%s1913_s1 + $0x200] sm:$0xff]  ;;  %v220_v35 = vld [vmem:[%s1913_s1 + $0x1b0] sm:$0xff]  ;;  %v251_v37 = vld [vmem:[%s1913_s1 + $0x178] sm:$0xff]  ;;  %p1066_p3 = pnand %p1065_p2, %p1061_p13 }
  0x1f   : > { %465 = vmatpush.msra.mxu3 %v224_v20  ;;  %411 = vmatpush.msra.mxu0 %v196_v23  ;;  %v252_v34 = vld [vmem:[%s1913_s1 + $0x1c0] sm:$0xff]  ;;  %v235_v36 = vld [vmem:[%s1913_s1 + $0x170] sm:$0xff]  ;;  %v219_v38 = vld [vmem:[%s1913_s1 + $0x168] sm:$0xff] }
  0x20   : > { %423 = vmatpush.msra.mxu1 %v239_v21  ;;  %443 = vmatpush.msra.mxu2 %v255_v22  ;;  %v234_v39 = vld [vmem:[%s1913_s1 + $0x128] sm:$0xff]  ;;  %v250_v40 = vld [vmem:[%s1913_s1 + $0x130] sm:$0xff]  ;;  %v218_v41 = vld [vmem:[%s1913_s1 + $0x120] sm:$0xff] }
  0x21   : > { %466 = vmatpush.msra.mxu3 %v223_v24  ;;  %412 = vmatpush.msra.mxu0 %v195_v27  ;;  %v233_v42 = vld [vmem:[%s1913_s1 + $0xe0] sm:$0xff]  ;;  %v249_v43 = vld [vmem:[%s1913_s1 + $0xe8] sm:$0xff]  ;;  %v217_v44 = vld [vmem:[%s1913_s1 + $0xd8] sm:$0xff] }
  0x22   : > { %424 = vmatpush.msra.mxu1 %v238_v25  ;;  %444 = vmatpush.msra.mxu2 %v254_v26  ;;  %v232_v45 = vld [vmem:[%s1913_s1 + $0x98] sm:$0xff]  ;;  %v248_v46 = vld [vmem:[%s1913_s1 + $0xa0] sm:$0xff]  ;;  %v231_v47 = vld [vmem:[%s1913_s1 + $0x50] sm:$0xff] }
  0x23   : > { %467 = vmatpush.msra.mxu3 %v222_v28  ;;  %974 = vmatmul.msk.f32.vlgmr.msra.gmra.mxu0 %vm393_vm0, %v200_v29  ;;  %v247_v48 = vld [vmem:[%s1913_s1 + $0x58] sm:$0xff]  ;;  %v216_v49 = vld [vmem:[%s1913_s1 + $0x90] sm:$0xff]  ;;  %v230_v50 = vld [vmem:[%s1913_s1 + $0x8] sm:$0xff] }
  0x24   : > { %425 = vmatpush.msra.mxu1 %v237_v30  ;;  %445 = vmatpush.msra.mxu2 %v253_v31  ;;  %v246_v51 = vld [vmem:[%s1913_s1 + $0x10] sm:$0xff]  ;;  %v215_v52 = vld [vmem:[%s1913_s1 + $0x48] sm:$0xff]  ;;  %v214_v53 = vld [vmem:[%s1913_s1] sm:$0xff] }
  0x25   : > { %468 = vmatpush.msra.mxu3 %v221_v32  ;;  %v293_v54 = vld [vmem:[%s1913_s1 + $0x458] sm:$0xff]  ;;  %v292_v55 = vld [vmem:[%s1913_s1 + $0x410] sm:$0xff]  ;;  %v291_v56 = vld [vmem:[%s1913_s1 + $0x3c8] sm:$0xff] }
  0x26   : > { %426 = vmatpush.msra.mxu1 %v236_v33  ;;  %446 = vmatpush.msra.mxu2 %v252_v34  ;;  %v290_v57 = vld [vmem:[%s1913_s1 + $0x380] sm:$0xff]  ;;  %v289_v58 = vld [vmem:[%s1913_s1 + $0x338] sm:$0xff]  ;;  %v288_v59 = vld [vmem:[%s1913_s1 + $0x2f0] sm:$0xff] }
  0x27   : > { %469 = vmatpush.msra.mxu3 %v220_v35  ;;  %483 = vmatpush.msrb.mxu0 %v293_v54  ;;  %v287_v60 = vld [vmem:[%s1913_s1 + $0x2a8] sm:$0xff]  ;;  %v201_v61 = vld [vmem:[%s1915_s3] sm:$0xf0]  ;;  %v285_v3 = vld [vmem:[%s1913_s1 + $0x218] sm:$0xff] }
  0x28   : > { %427 = vmatpush.msra.mxu1 %v235_v36  ;;  %447 = vmatpush.msra.mxu2 %v251_v37  ;;  %v391_v62 = vrot.slane %v201_v61, 4  ;;  %v286_v2 = vld [vmem:[%s1913_s1 + $0x260] sm:$0xff]  ;;  %v284_v4 = vld [vmem:[%s1913_s1 + $0x1d0] sm:$0xff]  ;;  %v283_v5 = vld [vmem:[%s1913_s1 + $0x188] sm:$0xff] }
  0x29   : > { %470 = vmatpush.msra.mxu3 %v219_v38  ;;  %484 = vmatpush.msrb.mxu0 %v292_v55  ;;  %v282_v6 = vld [vmem:[%s1913_s1 + $0x140] sm:$0xff]  ;;  %v281_v7 = vld [vmem:[%s1913_s1 + $0xf8] sm:$0xff]  ;;  %v280_v8 = vld [vmem:[%s1913_s1 + $0xb0] sm:$0xff] }
  0x2a   : > { %428 = vmatpush.msra.mxu1 %v234_v39  ;;  %448 = vmatpush.msra.mxu2 %v250_v40  ;;  %v279_v9 = vld [vmem:[%s1913_s1 + $0x68] sm:$0xff]  ;;  %v278_v10 = vld [vmem:[%s1913_s1 + $0x20] sm:$0xff]  ;;  %v202_v11 = vld [vmem:[%s1915_s3 + $0x10] ss:$0 sm:$0xff] }
  0x2b   : > { %471 = vmatpush.msra.mxu3 %v218_v41  ;;  %485 = vmatpush.msrb.mxu0 %v291_v56  ;;  %v203_v14 = vld [vmem:[%s1915_s3 + $0x11] ss:$0 sm:$0xff]  ;;  %v276_v33 = vld [vmem:[%s1913_s1 + $0x408] sm:$0xff]  ;;  %v275_v35 = vld [vmem:[%s1913_s1 + $0x3c0] sm:$0xff] }
  0x2c   : > { %429 = vmatpush.msra.mxu1 %v233_v42  ;;  %449 = vmatpush.msra.mxu2 %v249_v43  ;;  %v277_v32 = vld [vmem:[%s1913_s1 + $0x450] sm:$0xff]  ;;  %v274_v37 = vld [vmem:[%s1913_s1 + $0x378] sm:$0xff]  ;;  %v272_v41 = vld [vmem:[%s1913_s1 + $0x2e8] sm:$0xff] }
  0x2d   : > { %472 = vmatpush.msra.mxu3 %v217_v44  ;;  %486 = vmatpush.msrb.mxu0 %v290_v57  ;;  %v273_v39 = vld [vmem:[%s1913_s1 + $0x330] sm:$0xff]  ;;  %v271_v43 = vld [vmem:[%s1913_s1 + $0x2a0] sm:$0xff] }
  0x2e   : > { %430 = vmatpush.msra.mxu1 %v232_v45  ;;  %450 = vmatpush.msra.mxu2 %v248_v46  ;;  %v270_v45 = vld [vmem:[%s1913_s1 + $0x258] sm:$0xff]  ;;  %v265_v61 = vld [vmem:[%s1913_s1 + $0xf0] sm:$0xff] }
  0x2f   : > { %473 = vmatpush.msra.mxu3 %v216_v49  ;;  %487 = vmatpush.msrb.mxu0 %v289_v58 }
  0x30   : > { %431 = vmatpush.msra.mxu1 %v231_v47  ;;  %451 = vmatpush.msra.mxu2 %v247_v48 }
  0x31   : > { %474 = vmatpush.msra.mxu3 %v215_v52  ;;  %488 = vmatpush.msrb.mxu0 %v288_v59 }
  0x32   : > { %432 = vmatpush.msra.mxu1 %v230_v50  ;;  %452 = vmatpush.msra.mxu2 %v246_v51 }
  0x33   : > { %475 = vmatpush.msra.mxu3 %v214_v53  ;;  %489 = vmatpush.msrb.mxu0 %v287_v60 }
  0x34   : > { %975 = vmatpush.xpose.msk.msrb.mxu1 %vm536_vm1, %v293_v54  ;;  %617 = vmatpush.msrb.mxu2 %v277_v32 }
  0x35   : > { %490 = vmatpush.msrb.mxu0 %v286_v2 }
  0x36   : > { %618 = vmatpush.msrb.mxu2 %v276_v33 }
  0x37   : > { %491 = vmatpush.msrb.mxu0 %v285_v3 }
  0x38   : > { %976 = vmatpush.xpose.msk.msrb.mxu1 %vm536_vm1, %v292_v55  ;;  %619 = vmatpush.msrb.mxu2 %v275_v35 }
  0x39   : > { %492 = vmatpush.msrb.mxu0 %v284_v4 }
  0x3a   : > { %620 = vmatpush.msrb.mxu2 %v274_v37 }
  0x3b   : > { %493 = vmatpush.msrb.mxu0 %v283_v5 }
  0x3c   : > { %977 = vmatpush.xpose.msk.msrb.mxu1 %vm536_vm1, %v291_v56  ;;  %621 = vmatpush.msrb.mxu2 %v273_v39 }
  0x3d   : > { %494 = vmatpush.msrb.mxu0 %v282_v6 }
  0x3e   : > { %622 = vmatpush.msrb.mxu2 %v272_v41 }
  0x3f   : > { %495 = vmatpush.msrb.mxu0 %v281_v7 }
  0x40   : > { %978 = vmatpush.xpose.msk.msrb.mxu1 %vm536_vm1, %v290_v57  ;;  %623 = vmatpush.msrb.mxu2 %v271_v43  ;;  %v269_v57 = vld [vmem:[%s1913_s1 + $0x210] sm:$0xff]  ;;  %v338_v43 = vld [vmem:[%s1913_s1 + $0x420] sm:$0xff] }
  0x41   : > { %496 = vmatpush.msrb.mxu0 %v280_v8 }
  0x42   : > { %624 = vmatpush.msrb.mxu2 %v270_v45  ;;  %v336_v45 = vld [vmem:[%s1913_s1 + $0x3d8] sm:$0xff] }
  0x43   : > { %497 = vmatpush.msrb.mxu0 %v279_v9 }
  0x44   : > { %979 = vmatpush.xpose.msk.msrb.mxu1 %vm536_vm1, %v289_v58  ;;  %625 = vmatpush.msrb.mxu2 %v269_v57  ;;  %v268_v58 = vld [vmem:[%s1913_s1 + $0x1c8] sm:$0xff] }
  0x45   : > { %498 = vmatpush.msrb.mxu0 %v278_v10  ;;  %v324_v57 = vld [vmem:[%s1913_s1 + $0x228] sm:$0xff] }
  0x46   : > { %626 = vmatpush.msrb.mxu2 %v268_v58  ;;  %v325_v58 = vld [vmem:[%s1913_s1 + $0x230] sm:$0xff] }
  0x48   : > { %980 = vmatpush.xpose.msk.msrb.mxu1 %vm536_vm1, %v288_v59  ;;  %v267_v59 = vld [vmem:[%s1913_s1 + $0x180] sm:$0xff] }
  0x49   : > { %627 = vmatpush.msrb.mxu2 %v267_v59  ;;  %v322_v59 = vld [vmem:[%s1913_s1 + $0x1e0] sm:$0xff] }
  0x4c   : > { %981 = vmatpush.xpose.msk.msrb.mxu1 %vm536_vm1, %v287_v60  ;;  %v266_v60 = vld [vmem:[%s1913_s1 + $0x138] sm:$0xff] }
  0x4d   : > { %628 = vmatpush.msrb.mxu2 %v266_v60  ;;  %v323_v60 = vld [vmem:[%s1913_s1 + $0x1e8] sm:$0xff] }
  0x4f   : > { %629 = vmatpush.msrb.mxu2 %v265_v61  ;;  %v320_v61 = vld [vmem:[%s1913_s1 + $0x198] sm:$0xff] }
  0x50   : > { %982 = vmatpush.xpose.msk.msrb.mxu1 %vm536_vm1, %v286_v2  ;;  %v1461_v2 = vld [vmem:[%s1913_s1 + $0x460] sm:$0xff] }
  0x51   : > { %644 = vmatpush.msrb.mxu3 %v1461_v2  ;;  %673 = vmatpush.msra.mxu0 %v1461_v2 }
  0x54   : > { %983 = vmatpush.xpose.msk.msrb.mxu1 %vm536_vm1, %v285_v3  ;;  %v1466_v3 = vld [vmem:[%s1913_s1 + $0x418] sm:$0xff] }
  0x55   : > { %645 = vmatpush.msrb.mxu3 %v1466_v3  ;;  %674 = vmatpush.msra.mxu0 %v1466_v3 }
  0x58   : > { %984 = vmatpush.xpose.msk.msrb.mxu1 %vm536_vm1, %v284_v4  ;;  %v1473_v4 = vld [vmem:[%s1913_s1 + $0x3d0] sm:$0xff] }
  0x59   : > { %646 = vmatpush.msrb.mxu3 %v1473_v4  ;;  %675 = vmatpush.msra.mxu0 %v1473_v4 }
  0x5c   : > { %985 = vmatpush.xpose.msk.msrb.mxu1 %vm536_vm1, %v283_v5  ;;  %v1480_v5 = vld [vmem:[%s1913_s1 + $0x388] sm:$0xff] }
  0x5d   : > { %647 = vmatpush.msrb.mxu3 %v1480_v5  ;;  %676 = vmatpush.msra.mxu0 %v1480_v5 }
  0x60   : > { %986 = vmatpush.xpose.msk.msrb.mxu1 %vm536_vm1, %v282_v6  ;;  %v1487_v6 = vld [vmem:[%s1913_s1 + $0x340] sm:$0xff] }
  0x61   : > { %648 = vmatpush.msrb.mxu3 %v1487_v6  ;;  %677 = vmatpush.msra.mxu0 %v1487_v6 }
  0x64   : > { %987 = vmatpush.xpose.msk.msrb.mxu1 %vm536_vm1, %v281_v7  ;;  %v1494_v7 = vld [vmem:[%s1913_s1 + $0x2f8] sm:$0xff] }
  0x65   : > { %649 = vmatpush.msrb.mxu3 %v1494_v7  ;;  %678 = vmatpush.msra.mxu0 %v1494_v7 }
  0x68   : > { %988 = vmatpush.xpose.msk.msrb.mxu1 %vm536_vm1, %v280_v8  ;;  %v1501_v8 = vld [vmem:[%s1913_s1 + $0x2b0] sm:$0xff] }
  0x69   : > { %650 = vmatpush.msrb.mxu3 %v1501_v8  ;;  %679 = vmatpush.msra.mxu0 %v1501_v8 }
  0x6c   : > { %989 = vmatpush.xpose.msk.msrb.mxu1 %vm536_vm1, %v279_v9  ;;  %v204_v9 = vld [vmem:[%s1915_s3 + $0x12] ss:$0 sm:$0xff] }
  0x70   : > { %990 = vmatpush.xpose.msk.msrb.mxu1 %vm536_vm1, %v278_v10 }
  0xa0   : > { %v414_v63 = vpop.f32.mrf.mxu0 }
  0xa1   : > { %v1355_v0 = vadd.f32 %v414_v63, %v391_v62  ;;  %v264_v62 = vld [vmem:[%s1913_s1 + $0xa8] sm:$0xff]  ;;  %v263_v63 = vld [vmem:[%s1913_s1 + $0x60] sm:$0xff] }
  0xa2   : > { %630 = vmatpush.msrb.mxu2 %v264_v62  ;;  %v321_v62 = vld [vmem:[%s1913_s1 + $0x1a0] sm:$0xff] }
  0xa3   : > { %433 = vmatmul.f32.vlgmr.msra.gmra.mxu1 %v1355_v0  ;;  %453 = vmatmul.f32.vlgmr.msra.gmra.mxu2 %v1355_v0  ;;  %v458_v1 = vrot.slane %v1355_v0, 3 }
  0xa4   : > { %631 = vmatpush.msrb.mxu2 %v263_v63  ;;  %v318_v63 = vld [vmem:[%s1913_s1 + $0x150] sm:$0xff] }
  0xa5   : > { %476 = vmatmul.f32.vlgmr.msra.gmra.mxu3 %v458_v1  ;;  %v262_v1 = vld [vmem:[%s1913_s1 + $0x18] sm:$0xff] }
  0xa6   : > { %632 = vmatpush.msrb.mxu2 %v262_v1  ;;  %v319_v1 = vld [vmem:[%s1913_s1 + $0x158] sm:$0xff] }
 0x120   : > { %v434_v15 = vpop.f32.mrf.mxu1 }
 0x121   : > { %v435_v17 = vadd.f32 %v434_v15, %v203_v14  ;;  %v1525_v15 = vld [vmem:[%s1913_s1 + $0x1d8] sm:$0xff] }
 0x126   : > { %v454_v10 = vpop.f32.mrf.mxu2 }
 0x128   : > { %v477_v12 = vpop.f32.mrf.mxu3 }
 0x129   : > { %v478_v13 = vadd.f32 %v477_v12, %v202_v11  ;;  %v1511_v11 = vld [vmem:[%s1913_s1 + $0x268] sm:$0xff]  ;;  %v1518_v12 = vld [vmem:[%s1913_s1 + $0x220] sm:$0xff] }
 0x12a   : > { %651 = vmatpush.msrb.mxu3 %v1511_v11  ;;  %680 = vmatpush.msra.mxu0 %v1511_v11 }
 0x12b   : > { %v480_v16 = vmul.f32 0.5, %v478_v13  ;;  %v455_v13 = vadd.f32 %v454_v10, %v204_v9  ;;  %v316_v9 = vld [vmem:[%s1913_s1 + $0x108] sm:$0xff]  ;;  %v317_v10 = vld [vmem:[%s1913_s1 + $0x110] sm:$0xff] }
 0x12c   : > { %652 = vmatpush.msrb.mxu3 %v1518_v12  ;;  %681 = vmatpush.msra.mxu0 %v1518_v12 }
 0x12d   : > { %v481_v18 = vperm.slane %v480_v16, 0 }
 0x12e   : > { %653 = vmatpush.msrb.mxu3 %v1525_v15  ;;  %682 = vmatpush.msra.mxu0 %v1525_v15 }
 0x12f   : > { %v482_v19 = vmul.f32 %v481_v18, %v435_v17  ;;  %v1532_v17 = vld [vmem:[%s1913_s1 + $0x190] sm:$0xff] }
 0x130   : > { %654 = vmatpush.msrb.mxu3 %v1532_v17  ;;  %683 = vmatpush.msra.mxu0 %v1532_v17 }
 0x131   : > { %499 = vmatmul.f32.vlgmr.msrb.gmra.mxu0 %v482_v19 }
 0x1ae   : > { %v500_v20 = vpop.f32.mrf.mxu0 }
 0x1af   : > { %v504_v21 = vsel %vm503_vm2, %v500_v20, -inf }
 0x1b0   : > { %v505_v22 = vrot.slane %v504_v21, 4 }
 0x1b2   : > { %v506_v23 = vmax.f32 %v504_v21, %v505_v22 }
 0x1b4   : > { %v507_v24 = vrot.slane %v506_v23, 2 }
 0x1b6   : > { %v508_v25 = vmax.f32 %v506_v23, %v507_v24 }
 0x1b8   : > { %v509_v26 = vrot.slane %v508_v25, 1 }
 0x1ba   : > { %v510_v27 = vmax.f32 %v508_v25, %v509_v26  ;;  %v1541_v25 = vld [vmem:[%s1913_s1 + $0x148] sm:$0xff]  ;;  %v1548_v26 = vld [vmem:[%s1913_s1 + $0x100] sm:$0xff] }
 0x1bb   : > { %655 = vmatpush.msrb.mxu3 %v1541_v25  ;;  %684 = vmatpush.msra.mxu0 %v1541_v25 }
 0x1bc   : > { %v511_v28 = vsub.f32 %v500_v20, %v510_v27  ;;  %v1555_v27 = vld [vmem:[%s1913_s1 + $0xb8] sm:$0xff] }
 0x1bd   : > { %656 = vmatpush.msrb.mxu3 %v1548_v26  ;;  %685 = vmatpush.msra.mxu0 %v1548_v26 }
 0x1be   : > { %v512_v29 = vmul.f32 1.442695, %v511_v28  ;;  %v1562_v28 = vld [vmem:[%s1913_s1 + $0x70] sm:$0xff] }
 0x1bf   : > { %657 = vmatpush.msrb.mxu3 %v1555_v27  ;;  %686 = vmatpush.msra.mxu0 %v1555_v27 }
 0x1c0   : > { %1034 = vpow2.f32 %v512_v29  ;;  %v1567_v29 = vld [vmem:[%s1913_s1 + $0x28] sm:$0xff] }
 0x1c1   : > { %658 = vmatpush.msrb.mxu3 %v1562_v28  ;;  %687 = vmatpush.msra.mxu0 %v1562_v28 }
 0x1c3   : > { %659 = vmatpush.msrb.mxu3 %v1567_v29  ;;  %688 = vmatpush.msra.mxu0 %v1567_v29 }
 0x1c6   : > { %v1035_v30 = vpop.eup %1034 }
 0x1c7   : > { %v514_v31 = vsel %vm503_vm2, %v1035_v30, 0.0 }
 0x1c8   : > { %v515_v34 = vrot.slane %v514_v31, 4 }
 0x1ca   : > { %v516_v36 = vadd.f32 %v515_v34, %v514_v31 }
 0x1cc   : > { %v517_v38 = vrot.slane %v516_v36, 2 }
 0x1ce   : > { %v518_v40 = vadd.f32 %v517_v38, %v516_v36 }
 0x1d0   : > { %v519_v42 = vrot.slane %v518_v40, 1 }
 0x1d2   : > { %v520_v44 = vadd.f32 %v519_v42, %v518_v40  ;;  %v340_v42 = vld [vmem:[%s1913_s1 + $0x468] sm:$0xff] }
 0x1d3   : > { %719 = vmatpush.msra.mxu2 %v340_v42  ;;  %v382_v42 = vld [vmem:[%s1914_s2 + $0xc0] sm:$0xff] }
 0x1d4   : > { %1036 = vrcp.f32 %v520_v44  ;;  %v532_v49 = vand.u32 2147483648, %v520_v44  ;;  %v530_v51 = vand.u32 2147483647, %v520_v44  ;;  %vm526_vm4 = vweird.f32 %v520_v44 }
 0x1d5   : > { %720 = vmatpush.msra.mxu2 %v338_v43  ;;  %v381_v43 = vld [vmem:[%s1914_s2 + $0xb8] sm:$0xff] }
 0x1d6   : > { %v533_v53 = vor.u32 1.1754944e-38, %v532_v49  ;;  %vm531_vm6 = vcmp.eq.f32.partialorder %v530_v51, 8.507059e+37  ;;  %v332_v49 = vld [vmem:[%s1913_s1 + $0x348] sm:$0xff]  ;;  %v330_v51 = vld [vmem:[%s1913_s1 + $0x300] sm:$0xff] }
 0x1d7   : > { %721 = vmatpush.msra.mxu2 %v336_v45  ;;  %v380_v45 = vld [vmem:[%s1914_s2 + $0xb0] sm:$0xff] }
 0x1da   : > { %v1037_v46 = vpop.eup %1036 }
 0x1db   : > { %v522_v47 = vmul.f32 %v1037_v46, %v520_v44  ;;  %vm527_vm3 = vweird.f32 %v1037_v46  ;;  %v339_v44 = vld [vmem:[%s1913_s1 + $0x428] sm:$0xff] }
 0x1dc   : > { %vm528_vm5 = vmor %vm526_vm4, %vm527_vm3 }
 0x1dd   : > { %v523_v48 = vsub.f32 1.0, %v522_v47  ;;  %v334_v47 = vld [vmem:[%s1913_s1 + $0x390] sm:$0xff] }
 0x1de   : > { %722 = vmatpush.msra.mxu2 %v334_v47  ;;  %v379_v47 = vld [vmem:[%s1914_s2 + $0xa8] sm:$0xff] }
 0x1df   : > { %v524_v50 = vmul.f32 %v1037_v46, %v523_v48  ;;  %v335_v48 = vld [vmem:[%s1913_s1 + $0x398] sm:$0xff] }
 0x1e0   : > { %723 = vmatpush.msra.mxu2 %v332_v49  ;;  %v378_v49 = vld [vmem:[%s1914_s2 + $0xa0] sm:$0xff] }
 0x1e1   : > { %v525_v52 = vadd.f32 %v1037_v46, %v524_v50  ;;  %v333_v50 = vld [vmem:[%s1913_s1 + $0x350] sm:$0xff] }
 0x1e2   : > { %724 = vmatpush.msra.mxu2 %v330_v51  ;;  %v361_v51 = vld [vmem:[%s1914_s2 + $0x18] sm:$0xff] }
 0x1e3   : > { %v529_v54 = vsel %vm528_vm5, %v1037_v46, %v525_v52  ;;  %v337_v46 = vld [vmem:[%s1913_s1 + $0x3e0] sm:$0xff]  ;;  %v331_v52 = vld [vmem:[%s1913_s1 + $0x308] sm:$0xff] }
 0x1e4   : > { %v534_v55 = vsel %vm531_vm6, %v533_v53, %v529_v54  ;;  %v328_v53 = vld [vmem:[%s1913_s1 + $0x2b8] sm:$0xff]  ;;  %v329_v54 = vld [vmem:[%s1913_s1 + $0x2c0] sm:$0xff] }
 0x1e5   : > { %v535_v56 = vmul.f32 %v1035_v30, %v534_v55  ;;  %v205_v30 = vld [vmem:[%s1915_s3 + $0x13] ss:$0 sm:$0xff]  ;;  %725 = vmatpush.msra.mxu2 %v328_v53 }
 0x1e6   : > { %v326_v55 = vld [vmem:[%s1913_s1 + $0x270] sm:$0xff] }
 0x1e7   : > { %991 = vmatmul.msk.f32.vlgmr.msrb.gmra.mxu1 %vm536_vm1, %v535_v56  ;;  %v327_v56 = vld [vmem:[%s1913_s1 + $0x278] sm:$0xff]  ;;  %726 = vmatpush.msra.mxu2 %v326_v55 }
 0x1e9   : > { %727 = vmatpush.msra.mxu2 %v324_v57  ;;  %v374_v57 = vld [vmem:[%s1914_s2 + $0x80] sm:$0xff] }
 0x1eb   : > { %728 = vmatpush.msra.mxu2 %v322_v59 }
 0x1ed   : > { %729 = vmatpush.msra.mxu2 %v320_v61 }
 0x1ef   : > { %730 = vmatpush.msra.mxu2 %v318_v63 }
 0x1f1   : > { %731 = vmatpush.msra.mxu2 %v316_v9 }
 0x264   : > { %v605_v14 = vpop.f32.mrf.mxu1 }
 0x265   : > { %v608_v16 = vmul.f32 %v605_v14, %v455_v13  ;;  %v314_v13 = vld [vmem:[%s1913_s1 + $0xc0] sm:$0xff]  ;;  %v315_v14 = vld [vmem:[%s1913_s1 + $0xc8] sm:$0xff] }
 0x266   : > { %732 = vmatpush.msra.mxu2 %v314_v13  ;;  %v210_v13 = vld [vmem:[%s1915_s3 + $0x17] ss:$0 sm:$0xff] }
 0x267   : > { %v610_v18 = vsel %vm609_vm7, %v608_v16, 0.0  ;;  %v312_v16 = vld [vmem:[%s1913_s1 + $0x78] sm:$0xff] }
 0x268   : > { %v611_v19 = vrot.slane %v610_v18, 4  ;;  %733 = vmatpush.msra.mxu2 %v312_v16 }
 0x26a   : > { %v612_v20 = vadd.f32 %v611_v19, %v610_v18  ;;  %v313_v18 = vld [vmem:[%s1913_s1 + $0x80] sm:$0xff]  ;;  %v310_v19 = vld [vmem:[%s1913_s1 + $0x30] sm:$0xff] }
 0x26b   : > { %734 = vmatpush.msra.mxu2 %v310_v19 }
 0x26c   : > { %v613_v21 = vrot.slane %v612_v20, 2 }
 0x26e   : > { %v614_v22 = vadd.f32 %v613_v21, %v612_v20  ;;  %v311_v20 = vld [vmem:[%s1913_s1 + $0x38] sm:$0xff] }
 0x270   : > { %v615_v23 = vrot.slane %v614_v22, 1 }
 0x272   : > { %v616_v24 = vadd.f32 %v615_v23, %v614_v22  ;;  %v373_v23 = vld [vmem:[%s1914_s2 + $0x78] sm:$0xff] }
 0x273   : > { %761 = vmatpush.msrb.mxu0 %v373_v23 }
 0x274   : > { %633 = vmatmul.f32.vlgmr.msrb.gmra.mxu2 %v616_v24  ;;  %v389_v24 = vld [vmem:[%s1914_s2 + $0xf8] sm:$0xff] }
 0x275   : > { %808 = vmatpush.msrb.mxu2 %v1461_v2  ;;  %781 = vmatpush.msra.mxu1 %v389_v24 }
 0x277   : > { %809 = vmatpush.msrb.mxu2 %v1466_v3 }
 0x279   : > { %810 = vmatpush.msrb.mxu2 %v1473_v4 }
 0x27b   : > { %811 = vmatpush.msrb.mxu2 %v1480_v5 }
 0x27d   : > { %812 = vmatpush.msrb.mxu2 %v1487_v6 }
 0x27f   : > { %813 = vmatpush.msrb.mxu2 %v1494_v7 }
 0x281   : > { %814 = vmatpush.msrb.mxu2 %v1501_v8 }
 0x283   : > { %815 = vmatpush.msrb.mxu2 %v1511_v11 }
 0x285   : > { %816 = vmatpush.msrb.mxu2 %v1518_v12 }
 0x287   : > { %817 = vmatpush.msrb.mxu2 %v1525_v15 }
 0x289   : > { %818 = vmatpush.msrb.mxu2 %v1532_v17 }
 0x28b   : > { %819 = vmatpush.msrb.mxu2 %v1541_v25 }
 0x28d   : > { %820 = vmatpush.msrb.mxu2 %v1548_v26 }
 0x28f   : > { %821 = vmatpush.msrb.mxu2 %v1555_v27 }
 0x291   : > { %822 = vmatpush.msrb.mxu2 %v1562_v28 }
 0x293   : > { %823 = vmatpush.msrb.mxu2 %v1567_v29 }
 0x2f7   : > { %v634_v31 = vpop.f32.mrf.mxu2 }
 0x2f8   : > { %v635_v32 = vadd.f32 %v634_v31, %v205_v30  ;;  %v372_v30 = vld [vmem:[%s1914_s2 + $0x70] sm:$0xff] }
 0x2f9   : > { %v388_v31 = vld [vmem:[%s1914_s2 + $0xf0] sm:$0xff]  ;;  %762 = vmatpush.msrb.mxu0 %v372_v30 }
 0x2fa   : > { %v638_v33 = vrot.slane %v635_v32, 5  ;;  %782 = vmatpush.msra.mxu1 %v388_v31 }
 0x2fc   : > { %v640_v34 = vadd.f32 %v638_v33, %v1355_v0  ;;  %v341_v0 = vld [vmem:[%s1913_s1 + $0x470] sm:$0xff]  ;;  %v371_v33 = vld [vmem:[%s1914_s2 + $0x68] sm:$0xff] }
 0x2fd   : > { %739 = vmatpush.msra.mxu3 %v341_v0  ;;  %763 = vmatpush.msrb.mxu0 %v371_v33 }
 0x2fe   : > { %v642_v35 = vrot.slane %v640_v34, 3 }
 0x2ff   : > { %740 = vmatpush.msra.mxu3 %v339_v44 }
 0x300   : > { %660 = vmatmul.f32.vlgmr.msrb.gmra.mxu3 %v642_v35  ;;  %v386_v35 = vld [vmem:[%s1914_s2 + $0xe0] sm:$0xff] }
 0x301   : > { %741 = vmatpush.msra.mxu3 %v337_v46 }
 0x303   : > { %742 = vmatpush.msra.mxu3 %v335_v48 }
 0x305   : > { %743 = vmatpush.msra.mxu3 %v333_v50 }
 0x307   : > { %744 = vmatpush.msra.mxu3 %v331_v52  ;;  %v377_v52 = vld [vmem:[%s1914_s2 + $0x98] sm:$0xff] }
 0x309   : > { %745 = vmatpush.msra.mxu3 %v329_v54  ;;  %v207_v54 = vld [vmem:[%s1915_s3 + $0x15] ss:$0 sm:$0xff] }
 0x30b   : > { %746 = vmatpush.msra.mxu3 %v327_v56  ;;  %v358_v56 = vld [vmem:[%s1914_s2] sm:$0xff] }
 0x30d   : > { %747 = vmatpush.msra.mxu3 %v325_v58  ;;  %v973_v58 = vld [vmem:[%s1915_s3 + $0x16] ss:$8 sm:$0x3] }
 0x30e   : > { %v715_v59 = vperm.slane %v973_v58, 0 }
 0x30f   : > { %748 = vmatpush.msra.mxu3 %v323_v60  ;;  %v716_v60 = vperm.slane %v973_v58, 1 }
 0x311   : > { %749 = vmatpush.msra.mxu3 %v321_v62 }
 0x313   : > { %750 = vmatpush.msra.mxu3 %v319_v1 }
 0x315   : > { %751 = vmatpush.msra.mxu3 %v317_v10 }
 0x317   : > { %752 = vmatpush.msra.mxu3 %v315_v14 }
 0x319   : > { %753 = vmatpush.msra.mxu3 %v313_v18 }
 0x31b   : > { %754 = vmatpush.msra.mxu3 %v311_v20 }
 0x31d   : > { %837 = vmatpush.msrb.mxu3 %v1461_v2  ;;  %v370_v2 = vld [vmem:[%s1914_s2 + $0x60] sm:$0xff] }
 0x31e   : > { %764 = vmatpush.msrb.mxu0 %v370_v2  ;;  %v356_v2 = vld [vmem:[%s1913_s1 + $0x430] sm:$0xff] }
 0x31f   : > { %838 = vmatpush.msrb.mxu3 %v1466_v3  ;;  %v369_v3 = vld [vmem:[%s1914_s2 + $0x58] sm:$0xff] }
 0x320   : > { %765 = vmatpush.msrb.mxu0 %v369_v3  ;;  %v354_v3 = vld [vmem:[%s1913_s1 + $0x3a0] sm:$0xff] }
 0x321   : > { %839 = vmatpush.msrb.mxu3 %v1473_v4  ;;  %v368_v4 = vld [vmem:[%s1914_s2 + $0x50] sm:$0xff] }
 0x322   : > { %766 = vmatpush.msrb.mxu0 %v368_v4  ;;  %v352_v4 = vld [vmem:[%s1913_s1 + $0x310] sm:$0xff] }
 0x323   : > { %840 = vmatpush.msrb.mxu3 %v1480_v5  ;;  %v367_v5 = vld [vmem:[%s1914_s2 + $0x48] sm:$0xff] }
 0x324   : > { %767 = vmatpush.msrb.mxu0 %v367_v5  ;;  %v349_v5 = vld [vmem:[%s1913_s1 + $0x238] sm:$0xff] }
 0x325   : > { %841 = vmatpush.msrb.mxu3 %v1487_v6  ;;  %v366_v6 = vld [vmem:[%s1914_s2 + $0x40] sm:$0xff] }
 0x326   : > { %768 = vmatpush.msrb.mxu0 %v366_v6  ;;  %v346_v6 = vld [vmem:[%s1913_s1 + $0x160] sm:$0xff] }
 0x327   : > { %842 = vmatpush.msrb.mxu3 %v1494_v7  ;;  %v365_v7 = vld [vmem:[%s1914_s2 + $0x38] sm:$0xff] }
 0x328   : > { %769 = vmatpush.msrb.mxu0 %v365_v7  ;;  %v343_v7 = vld [vmem:[%s1913_s1 + $0x88] sm:$0xff] }
 0x329   : > { %843 = vmatpush.msrb.mxu3 %v1501_v8  ;;  %v364_v8 = vld [vmem:[%s1914_s2 + $0x30] sm:$0xff] }
 0x32a   : > { %770 = vmatpush.msrb.mxu0 %v364_v8 }
 0x32b   : > { %844 = vmatpush.msrb.mxu3 %v1511_v11  ;;  %v363_v11 = vld [vmem:[%s1914_s2 + $0x28] sm:$0xff] }
 0x32c   : > { %771 = vmatpush.msrb.mxu0 %v363_v11 }
 0x32d   : > { %845 = vmatpush.msrb.mxu3 %v1518_v12  ;;  %v362_v12 = vld [vmem:[%s1914_s2 + $0x20] sm:$0xff] }
 0x32e   : > { %772 = vmatpush.msrb.mxu0 %v362_v12 }
 0x32f   : > { %846 = vmatpush.msrb.mxu3 %v1525_v15 }
 0x330   : > { %773 = vmatpush.msrb.mxu0 %v361_v51  ;;  %v211_v51 = vld [vmem:[%s1915_s3 + $0x20] ss:$0 sm:$0xff] }
 0x331   : > { %847 = vmatpush.msrb.mxu3 %v1532_v17  ;;  %v206_v17 = vld [vmem:[%s1915_s3 + $0x14] ss:$0 sm:$0xff] }
 0x333   : > { %848 = vmatpush.msrb.mxu3 %v1541_v25 }
 0x335   : > { %849 = vmatpush.msrb.mxu3 %v1548_v26  ;;  %v360_v26 = vld [vmem:[%s1914_s2 + $0x10] sm:$0xff] }
 0x336   : > { %774 = vmatpush.msrb.mxu0 %v360_v26 }
 0x337   : > { %850 = vmatpush.msrb.mxu3 %v1555_v27  ;;  %v376_v27 = vld [vmem:[%s1914_s2 + $0x90] sm:$0xff] }
 0x339   : > { %851 = vmatpush.msrb.mxu3 %v1562_v28  ;;  %v359_v28 = vld [vmem:[%s1914_s2 + $0x8] sm:$0xff] }
 0x33a   : > { %775 = vmatpush.msrb.mxu0 %v359_v28 }
 0x33b   : > { %852 = vmatpush.msrb.mxu3 %v1567_v29  ;;  %v375_v29 = vld [vmem:[%s1914_s2 + $0x88] sm:$0xff] }
 0x33c   : > { %776 = vmatpush.msrb.mxu0 %v358_v56 }
 0x383   : > { %v661_v36 = vpop.f32.mrf.mxu3 }
 0x384   : > { %v664_v37 = vmul.f32 0.0625, %v661_v36  ;;  %v385_v36 = vld [vmem:[%s1914_s2 + $0xd8] sm:$0xff] }
 0x386   : > { %v666_v38 = vrot.slane %v664_v37, 5  ;;  %v384_v37 = vld [vmem:[%s1914_s2 + $0xd0] sm:$0xff] }
 0x388   : > { %v1577_v39 = vsub.f32 %v640_v34, %v666_v38  ;;  %v387_v34 = vld [vmem:[%s1914_s2 + $0xe8] sm:$0xff] }
 0x389   : > { %783 = vmatpush.msra.mxu1 %v387_v34  ;;  %v357_v34 = vld [vmem:[%s1913_s1 + $0x478] sm:$0xff] }
 0x38a   : > { %v669_v40 = vmul.f32 %v1577_v39, %v1577_v39 }
 0x38b   : > { %784 = vmatpush.msra.mxu1 %v386_v35  ;;  %v355_v35 = vld [vmem:[%s1913_s1 + $0x3e8] sm:$0xff] }
 0x38c   : > { %v671_v41 = vrot.slane %v669_v40, 3  ;;  %v383_v40 = vld [vmem:[%s1914_s2 + $0xc8] sm:$0xff] }
 0x38d   : > { %785 = vmatpush.msra.mxu1 %v385_v36  ;;  %v353_v36 = vld [vmem:[%s1913_s1 + $0x358] sm:$0xff] }
 0x38e   : > { %689 = vmatmul.f32.vlgmr.msra.gmra.mxu0 %v671_v41 }
 0x38f   : > { %786 = vmatpush.msra.mxu1 %v384_v37  ;;  %878 = vmatpush.msra.mxu0 %v357_v34  ;;  %v351_v37 = vld [vmem:[%s1913_s1 + $0x2c8] sm:$0xff] }
 0x391   : > { %787 = vmatpush.msra.mxu1 %v383_v40  ;;  %879 = vmatpush.msra.mxu0 %v356_v2  ;;  %v348_v40 = vld [vmem:[%s1913_s1 + $0x1f0] sm:$0xff] }
 0x393   : > { %788 = vmatpush.msra.mxu1 %v382_v42  ;;  %880 = vmatpush.msra.mxu0 %v355_v35  ;;  %v345_v42 = vld [vmem:[%s1913_s1 + $0x118] sm:$0xff] }
 0x395   : > { %789 = vmatpush.msra.mxu1 %v381_v43  ;;  %881 = vmatpush.msra.mxu0 %v354_v3  ;;  %v342_v43 = vld [vmem:[%s1913_s1 + $0x40] sm:$0xff] }
 0x397   : > { %790 = vmatpush.msra.mxu1 %v380_v45  ;;  %882 = vmatpush.msra.mxu0 %v353_v36 }
 0x399   : > { %791 = vmatpush.msra.mxu1 %v379_v47  ;;  %883 = vmatpush.msra.mxu0 %v352_v4 }
 0x39b   : > { %792 = vmatpush.msra.mxu1 %v378_v49  ;;  %884 = vmatpush.msra.mxu0 %v351_v37 }
 0x39d   : > { %793 = vmatpush.msra.mxu1 %v377_v52 }
 0x39f   : > { %794 = vmatpush.msra.mxu1 %v376_v27 }
 0x3a1   : > { %795 = vmatpush.msra.mxu1 %v375_v29 }
 0x3a3   : > { %796 = vmatpush.msra.mxu1 %v374_v57 }
 0x40b   : > { %v690_v21 = vpop.f32.mrf.mxu0 }
 0x40c   : > { %v693_v22 = vmul.f32 0.0625, %v690_v21 }
 0x40e   : > { %v1691_v32 = vadd.f32 1e-05, %v693_v22 }
 0x410   : > { %1038 = vrsqrt.f32 %v1691_v32  ;;  %vm701_vm9 = vweird.f32 %v1691_v32 }
 0x416   : > { %v1039_v38 = vpop.eup %1038 }
 0x417   : > { %v696_v41 = vmul.f32 %v1039_v38, %v1691_v32  ;;  %vm702_vm8 = vweird.f32 %v1039_v38 }
 0x418   : > { %vm703_vm10 = vmor %vm701_vm9, %vm702_vm8 }
 0x419   : > { %v697_v0 = vmul.f32 %v1039_v38, %v696_v41  ;;  %v347_v41 = vld [vmem:[%s1913_s1 + $0x1a8] sm:$0xff] }
 0x41b   : > { %v698_v44 = vmul.f32 0.5, %v697_v0  ;;  %v344_v0 = vld [vmem:[%s1913_s1 + $0xd0] sm:$0xff] }
 0x41d   : > { %v699_v46 = vsub.f32 1.5, %v698_v44 }
 0x41f   : > { %v700_v48 = vmul.f32 %v1039_v38, %v699_v46 }
 0x421   : > { %v704_v50 = vsel %vm703_vm10, %v1039_v38, %v700_v48  ;;  %v350_v38 = vld [vmem:[%s1913_s1 + $0x280] sm:$0xff] }
 0x422   : > { %v706_v15 = vrot.slane %v704_v50, 5  ;;  %885 = vmatpush.msra.mxu0 %v350_v38 }
 0x424   : > { %v708_v53 = vmul.f32 %v706_v15, %v1577_v39  ;;  %886 = vmatpush.msra.mxu0 %v349_v5 }
 0x426   : > { %v709_v55 = vmul.f32 %v708_v53, %v206_v17  ;;  %887 = vmatpush.msra.mxu0 %v348_v40  ;;  %v212_v17 = vld [vmem:[%s1915_s3 + $0x21] ss:$0 sm:$0xff] }
 0x428   : > { %v710_v25 = vadd.f32 %v709_v55, %v207_v54  ;;  %888 = vmatpush.msra.mxu0 %v347_v41 }
 0x42a   : > { %v712_v39 = vrot.slane %v710_v25, 3  ;;  %889 = vmatpush.msra.mxu0 %v346_v6 }
 0x42c   : > { %735 = vmatmul.f32.vlgmr.msra.gmra.mxu2 %v712_v39  ;;  %755 = vmatmul.f32.vlgmr.msra.gmra.mxu3 %v712_v39 }
 0x42d   : > { %890 = vmatpush.msra.mxu0 %v345_v42 }
 0x42f   : > { %891 = vmatpush.msra.mxu0 %v344_v0 }
 0x431   : > { %892 = vmatpush.msra.mxu0 %v343_v7 }
 0x433   : > { %893 = vmatpush.msra.mxu0 %v342_v43 }
 0x4af   : > { %v736_v61 = vpop.f32.mrf.mxu2  ;;  %v756_v62 = vpop.f32.mrf.mxu3 }
 0x4b0   : > { %v737_v63 = vadd.f32 %v736_v61, %v715_v59  ;;  %v757_v1 = vadd.f32 %v756_v62, %v716_v60 }
 0x4b2   : > { %v759_v9 = vmax.f32 %v737_v63, 0.0  ;;  %v760_v10 = vmax.f32 %v757_v1, 0.0 }
 0x4b4   : > { %777 = vmatmul.f32.vlgmr.msrb.gmra.mxu0 %v759_v9  ;;  %797 = vmatmul.f32.vlgmr.msra.gmra.mxu1 %v760_v10 }
 0x531   : > { %v778_v14 = vpop.f32.mrf.mxu0  ;;  %v798_v18 = vpop.f32.mrf.mxu1 }
 0x532   : > { %v779_v16 = vadd.f32 %v778_v14, %v210_v13 }
 0x534   : > { %v799_v19 = vadd.f32 %v798_v18, %v779_v16 }
 0x536   : > { %v802_v20 = vrot.slane %v799_v19, 5 }
 0x538   : > { %v804_v21 = vadd.f32 %v802_v20, %v710_v25  ;;  %v213_v25 = vld [vmem:[%s1915_s3 + $0x22] ss:$0 sm:$0xff] }
 0x53a   : > { %v806_v22 = vrot.slane %v804_v21, 3 }
 0x53c   : > { %824 = vmatmul.f32.vlgmr.msrb.gmra.mxu2 %v806_v22 }
 0x5bf   : > { %v825_v23 = vpop.f32.mrf.mxu2 }
 0x5c0   : > { %v828_v24 = vmul.f32 0.0625, %v825_v23 }
 0x5c2   : > { %v830_v30 = vrot.slane %v828_v24, 5 }
 0x5c4   : > { %v832_v31 = vsub.f32 %v804_v21, %v830_v30 }
 0x5c6   : > { %v833_v32 = vmul.f32 %v832_v31, %v832_v31 }
 0x5c8   : > { %v835_v33 = vrot.slane %v833_v32, 3 }
 0x5ca   : > { %853 = vmatmul.f32.vlgmr.msrb.gmra.mxu3 %v835_v33 }
 0x64d   : > { %v854_v44 = vpop.f32.mrf.mxu3 }
 0x64e   : > { %v857_v8 = vmul.f32 0.0625, %v854_v44 }
 0x650   : > { %v858_v45 = vadd.f32 1e-05, %v857_v8 }
 0x652   : > { %1040 = vrsqrt.f32 %v858_v45  ;;  %vm865_vm12 = vweird.f32 %v858_v45 }
 0x658   : > { %v1041_v46 = vpop.eup %1040 }
 0x659   : > { %v860_v11 = vmul.f32 %v1041_v46, %v858_v45  ;;  %vm866_vm11 = vweird.f32 %v1041_v46 }
 0x65a   : > { %vm867_vm13 = vmor %vm865_vm12, %vm866_vm11 }
 0x65b   : > { %v861_v47 = vmul.f32 %v1041_v46, %v860_v11 }
 0x65d   : > { %v862_v48 = vmul.f32 0.5, %v861_v47 }
 0x65f   : > { %v863_v12 = vsub.f32 1.5, %v862_v48 }
 0x661   : > { %v864_v49 = vmul.f32 %v1041_v46, %v863_v12 }
 0x663   : > { %v868_v50 = vsel %vm867_vm13, %v1041_v46, %v864_v49 }
 0x664   : > { %v870_v15 = vrot.slane %v868_v50, 5 }
 0x666   : > { %v872_v52 = vmul.f32 %v870_v15, %v832_v31 }
 0x668   : > { %v873_v53 = vmul.f32 %v872_v52, %v211_v51 }
 0x66a   : > { %v874_v54 = vadd.f32 %v873_v53, %v212_v17 }
 0x66c   : > { %v876_v55 = vrot.slane %v874_v54, 3 }
 0x66e   : > { %894 = vmatmul.f32.vlgmr.msra.gmra.mxu0 %v876_v55 }
 0x6eb   : > { %v895_v39 = vpop.f32.mrf.mxu0 }
 0x6ec   : > { %v896_v26 = vadd.f32 %v895_v39, %v213_v25 }
 0x6ee   : > { %899 = vst.msk [vmem:[%s189_s20] sm:$0x1] %vm898_vm14, %v896_v26 }
 0x6ef   : > { %1069 = shalt.err (!%p1066_p3)
}
 0x6f0   : > { %995 = dma.vmem_to_hbm [thread:$0]  (%p1169_p5), %s912_s22, 16, %s914_s23, %s901_s27  }
 0x6f1 PF: > { %p1001_p4 = scmp.ge.s32.totalorder %s1104_s18, 2  ;;  %s925_s13 = sand.u32 1, %s1092_s15  }
 0x6f2   : > { %s926_s8 = scalar_lea.sflag [#allocation3], %s925_s13 }
 0x6f3   : > { %p998_p7 = pnand %p1001_p4, %p1173_p6 }
 0x6f5   : > { %p999_p8 = pneg %p998_p7 }
 0x6f7   : > { %1087 = dma.done.wait (%p999_p8), %s926_s8, 16  }
 0x6f8   : > { %1089 = vsyncadd (%p999_p8), %s926_s8, 4294967280  ;;  %p14_p9 = scmp.ge.s32.totalorder %s1156_s21, 4   ;;  %s1919_s15 = smov %s1096_s16 }
 0x6f9   : > { %s1920_s16 = smov %s1100_s17  ;;  %s1921_s17 = smov %s1167_s24 }
 0x6fa   : > { %s1922_s18 = smov %s1156_s21  ;;  %16 = sbr.rel (!%p14_p9) target bundleno = 3 (0x3), region = 72 }
 0x6ff   :  { %931 = vsyncpa [#allocation3], 1 }
 0x700   :  { %933 = vsyncpa [#allocation3 + $0x1], 1 }

</bundles_post_ra>
